<compile_context>
chip_gen: v7x
topology: tpu7x:2x2x1
jax: 0.10.0
libtpu: 0.0.40
codegen_flags: <defaults>
</compile_context>

<pallas_src>
import math
import functools

import jax
import jax.numpy as jnp
from jax.experimental import pallas as pl
from jax.experimental.pallas import tpu as pltpu


def _round_up(x, m):
    return (x + m - 1) // m * m


def _aam_kernel(emb_ref, w_ref, inv_e_ref, inv_w_ref, label_ref, out_ref, *,
                cos_m, sin_m, th, mm, scale, easy_margin, tile_c):
    # MXU: (tb, dp) x (tc, dp)^T contracted over emb_dim, f32 accumulation.
    raw = jax.lax.dot_general(
        emb_ref[...], w_ref[...],
        dimension_numbers=(((1,), (1,)), ((), ())),
        preferred_element_type=jnp.float32)                        # (tb, tc)

    # Normalization folded into an output-side scale using precomputed rsqrt
    # factors (no per-tile norm recomputation, no normalized copies in VMEM).
    cosine = jnp.clip(raw * inv_e_ref[...] * inv_w_ref[...], -1.0, 1.0)

    # One-hot along the class axis, offset by this tile's class origin.
    col0 = pl.program_id(1) * tile_c
    cls_idx = col0 + jax.lax.broadcasted_iota(jnp.int32, cosine.shape, 1)
    one_hot = cls_idx == label_ref[...]                            # (tb, tc)

    # Margin epilogue only at the label column: masked lane reduce -> (tb, 1),
    # then sqrt / branch on the small vector and broadcast through the select.
    c_lab = jnp.sum(jnp.where(one_hot, cosine, 0.0), axis=-1, keepdims=True)
    sine_lab = jnp.sqrt(jnp.maximum(1.0 - c_lab * c_lab, 0.0))
    phi_lab = c_lab * cos_m - sine_lab * sin_m
    if easy_margin:
        phi_lab = jnp.where(c_lab > 0.0, phi_lab, c_lab)
    else:
        phi_lab = jnp.where(c_lab > th, phi_lab, c_lab - mm)

    out_ref[...] = (jnp.where(one_hot, phi_lab, cosine) * scale).astype(out_ref.dtype)


def additive_angular_margin(emb, class_centers, label, *,
                            scale, margin, easy_margin,
                            tile_b=1024, tile_c=1024,
                            vmem_budget_bytes=40 << 20):
    """ArcFace logits.  emb: (B, D); class_centers: (C, D); label: (B,) int."""
    B, D = emb.shape
    C, _ = class_centers.shape

    cos_m = math.cos(margin)
    sin_m = math.sin(margin)
    th = math.cos(math.pi - margin)
    mm = math.sin(math.pi - margin) * margin

    dp = _round_up(D, 128)
    eb = emb.dtype.itemsize
    wb = class_centers.dtype.itemsize

    # Prefer one batch tile (reads W exactly once) and big lane-dense class
    # tiles; shrink against the VMEM budget (double-buffered blocks + output).
    tb = min(_round_up(B, 8), _round_up(tile_b, 8))
    tc = min(_round_up(C, 128), _round_up(tile_c, 128))

    def vmem_est(tb_, tc_):
        per_step = (tb_ * dp * eb + tc_ * dp * wb + tb_ * tc_ * 4 +
                    tb_ * 4 + tc_ * 4 + tb_ * 4)
        return 2 * per_step                      # double-buffered

    while vmem_est(tb, tc) > vmem_budget_bytes and tc > 128:
        tc = max(128, _round_up(tc // 2, 128))
    while vmem_est(tb, tc) > vmem_budget_bytes and tb > 8:
        tb = max(8, _round_up(tb // 2, 8))

    bp = _round_up(B, tb)
    cp = _round_up(C, tc)

    # v7x megacore: if the batch collapsed to one tile, keep >=2 class tiles
    # when the class tile is big enough to split, so both TensorCores work.
    if bp == tb and cp == tc and tc >= 256:
        tc = _round_up((tc + 1) // 2, 128)
        cp = _round_up(C, tc)

    # Precompute normalization factors once (XLA), instead of per grid step.
    ef = emb.astype(jnp.float32)
    wf = class_centers.astype(jnp.float32)
    inv_e = jax.lax.rsqrt(
        jnp.maximum(jnp.sum(ef * ef, axis=-1, keepdims=True), 1e-24))  # (B, 1)
    inv_w = jax.lax.rsqrt(
        jnp.maximum(jnp.sum(wf * wf, axis=-1), 1e-24)).reshape(1, C)   # (1, C)

    # Pad only when actually needed (zero-padding D changes neither dots nor
    # norms; padded rows/columns are sliced away below).
    emb_p = emb if (bp, dp) == (B, D) else jnp.pad(emb, ((0, bp - B), (0, dp - D)))
    w_p = (class_centers if (cp, dp) == (C, D)
           else jnp.pad(class_centers, ((0, cp - C), (0, dp - D))))
    inv_e_p = inv_e if bp == B else jnp.pad(inv_e, ((0, bp - B), (0, 0)))
    inv_w_p = inv_w if cp == C else jnp.pad(inv_w, ((0, 0), (0, cp - C)))
    lbl = label.astype(jnp.int32).reshape(-1, 1)
    label_p = lbl if bp == B else jnp.pad(lbl, ((0, bp - B), (0, 0)),
                                          constant_values=-1)

    kernel = functools.partial(
        _aam_kernel,
        cos_m=cos_m, sin_m=sin_m, th=th, mm=mm,
        scale=float(scale), easy_margin=easy_margin, tile_c=tc)

    grid = (bp // tb, cp // tc)
    vmem_limit = int(max(vmem_est(tb, tc) + (8 << 20), 32 << 20))

    out = pl.pallas_call(
        kernel,
        out_shape=jax.ShapeDtypeStruct((bp, cp), jnp.float32),
        grid_spec=pltpu.PrefetchScalarGridSpec(
            num_scalar_prefetch=0,
            grid=grid,
            in_specs=[
                pl.BlockSpec((tb, dp), lambda i, j: (i, 0)),   # emb tile
                pl.BlockSpec((tc, dp), lambda i, j: (j, 0)),   # class-center tile
                pl.BlockSpec((tb, 1), lambda i, j: (i, 0)),    # inv |emb|
                pl.BlockSpec((1, tc), lambda i, j: (0, j)),    # inv |W|
                pl.BlockSpec((tb, 1), lambda i, j: (i, 0)),    # labels
            ],
            out_specs=pl.BlockSpec((tb, tc), lambda i, j: (i, j)),
        ),
        compiler_params=pltpu.CompilerParams(
            dimension_semantics=("parallel", "parallel"),
            vmem_limit_bytes=vmem_limit),
    )(emb_p, w_p, inv_e_p, inv_w_p, label_p)

    if (bp, cp) != (B, C):
        out = out[:B, :C]
    return out


def _reference(emb, class_centers, label, *, scale, margin, easy_margin):
    """Pure-JAX reference mirroring the PyTorch forward."""
    cos_m = math.cos(margin)
    sin_m = math.sin(margin)
    th = math.cos(math.pi - margin)
    mm = math.sin(math.pi - margin) * margin
    emb_n = emb / jnp.maximum(jnp.linalg.norm(emb, axis=1, keepdims=True), 1e-12)
    w_n = class_centers / jnp.maximum(
        jnp.linalg.norm(class_centers, axis=1, keepdims=True), 1e-12)
    cosine = jnp.clip(emb_n @ w_n.T, -1.0, 1.0)
    sine = jnp.sqrt(jnp.clip(1.0 - cosine ** 2, 0.0, 1.0))
    phi = cosine * cos_m - sine * sin_m
    if easy_margin:
        phi = jnp.where(cosine > 0, phi, cosine)
    else:
        phi = jnp.where(cosine > th, phi, cosine - mm)
    one_hot = jax.nn.one_hot(label, cosine.shape[1], dtype=cosine.dtype)
    return (one_hot * phi + (1.0 - one_hot) * cosine) * scale


if __name__ == "__main__":
    SCALE = 30.0
    MARGIN = 0.2
    EASY_MARGIN = False

    # --- Case 1: small, module-consistent shapes (single tile). ---
    B, EMB_DIM, NUM_CLASSES = 8, 32, 16
    key = jax.random.PRNGKey(0)
    k_emb, k_w, k_lbl = jax.random.split(key, 3)

    emb = jax.random.normal(k_emb, (B, EMB_DIM), dtype=jnp.float32)
    bound = math.sqrt(6.0 / (NUM_CLASSES + EMB_DIM))   # Xavier-uniform
    class_centers = jax.random.uniform(
        k_w, (NUM_CLASSES, EMB_DIM), minval=-bound, maxval=bound,
        dtype=jnp.float32)
    label = jax.random.randint(k_lbl, (B,), 0, NUM_CLASSES, dtype=jnp.int32)

    out = additive_angular_margin(
        emb, class_centers, label,
        scale=SCALE, margin=MARGIN, easy_margin=EASY_MARGIN)
    out = jax.block_until_ready(out)
    ref = _reference(emb, class_centers, label,
                     scale=SCALE, margin=MARGIN, easy_margin=EASY_MARGIN)
    assert out.shape == (B, NUM_CLASSES)
    assert jnp.allclose(out, ref, atol=2e-4, rtol=2e-4), "mismatch vs reference (case 1)"

    # --- Case 2: non-aligned shapes, forced (2, 3) grid (padding + one-hot
    #     class-tile offset path exercised). ---
    B2, D2, C2 = 16, 200, 300
    k_emb2, k_w2, k_lbl2 = jax.random.split(jax.random.PRNGKey(0), 3)
    emb2 = jax.random.normal(k_emb2, (B2, D2), dtype=jnp.float32)
    bound2 = math.sqrt(6.0 / (C2 + D2))
    cc2 = jax.random.uniform(k_w2, (C2, D2), minval=-bound2, maxval=bound2,
                             dtype=jnp.float32)
    label2 = jax.random.randint(k_lbl2, (B2,), 0, C2, dtype=jnp.int32)

    out2 = additive_angular_margin(
        emb2, cc2, label2, scale=SCALE, margin=MARGIN, easy_margin=EASY_MARGIN,
        tile_b=8, tile_c=128)   # force a (2, 3) grid
    out2 = jax.block_until_ready(out2)
    ref2 = _reference(emb2, cc2, label2,
                      scale=SCALE, margin=MARGIN, easy_margin=EASY_MARGIN)
    assert out2.shape == (B2, C2)
    assert jnp.allclose(out2, ref2, atol=2e-4, rtol=2e-4), "mismatch vs reference (case 2)"

    # --- Case 3: same shapes with default tiles — exercises the full-batch
    #     tile plus the megacore class-axis split (grid (1, 2)). ---
    out3 = additive_angular_margin(
        emb2, cc2, label2, scale=SCALE, margin=MARGIN, easy_margin=EASY_MARGIN)
    out3 = jax.block_until_ready(out3)
    assert out3.shape == (B2, C2)
    assert jnp.allclose(out3, ref2, atol=2e-4, rtol=2e-4), "mismatch vs reference (case 3)"

    print("KERNEL_OK")
</pallas_src>

<mosaic_0001>
module attributes {stable_mosaic.version = 11 : i64} {
  func.func @_aam_kernel(%arg0: i32, %arg1: i32, %arg2: memref<8x128xf32, #tpu.memory_space<vmem>>, %arg3: memref<128x128xf32, #tpu.memory_space<vmem>>, %arg4: memref<8x1xf32, #tpu.memory_space<vmem>>, %arg5: memref<1x128xf32, #tpu.memory_space<vmem>>, %arg6: memref<8x1xi32, #tpu.memory_space<vmem>>, %arg7: memref<8x128xf32, #tpu.memory_space<vmem>>) attributes {dimension_semantics = [#tpu.dimension_semantics<parallel>, #tpu.dimension_semantics<parallel>], iteration_bounds = array<i64: 1, 1>, scalar_prefetch = 0 : i64, scratch_operands = 0 : i64, tpu.core_type = #tpu.core_type<tc>, window_params = [{transform_indices = @transform_0, window_bounds = array<i64: 8, 128>}, {transform_indices = @transform_1, window_bounds = array<i64: 128, 128>}, {transform_indices = @transform_2, window_bounds = array<i64: 8, 1>}, {transform_indices = @transform_3, window_bounds = array<i64: 1, 128>}, {transform_indices = @transform_4, window_bounds = array<i64: 8, 1>}, {transform_indices = @transform_5, window_bounds = array<i64: 8, 128>}]} {
    %c0 = arith.constant 0 : index
    %c0_0 = arith.constant 0 : index
    %0 = vector.load %arg2[%c0, %c0_0] : memref<8x128xf32, #tpu.memory_space<vmem>>, vector<8x128xf32>
    %c0_1 = arith.constant 0 : index
    %c0_2 = arith.constant 0 : index
    %1 = vector.load %arg3[%c0_1, %c0_2] : memref<128x128xf32, #tpu.memory_space<vmem>>, vector<128x128xf32>
    %cst = arith.constant dense<0.000000e+00> : vector<8x128xf32>
    %2 = tpu.matmul %0, %1, %cst {dimension_numbers = #tpu.dot_dimension_numbers<[1], [1], [0], [0], [0, 0, 1, 0], [], []>} : vector<8x128xf32>, vector<128x128xf32>, vector<8x128xf32> -> vector<8x128xf32>
    %c0_3 = arith.constant 0 : index
    %c0_4 = arith.constant 0 : index
    %3 = vector.load %arg4[%c0_3, %c0_4] : memref<8x1xf32, #tpu.memory_space<vmem>>, vector<8x1xf32>
    %4 = vector.broadcast %3 : vector<8x1xf32> to vector<8x128xf32>
    %5 = arith.mulf %2, %4 : vector<8x128xf32>
    %c0_5 = arith.constant 0 : index
    %c0_6 = arith.constant 0 : index
    %6 = vector.load %arg5[%c0_5, %c0_6] : memref<1x128xf32, #tpu.memory_space<vmem>>, vector<1x128xf32>
    %7 = vector.broadcast %6 : vector<1x128xf32> to vector<8x128xf32>
    %8 = arith.mulf %5, %7 : vector<8x128xf32>
    %cst_7 = arith.constant -1.000000e+00 : f32
    %cst_8 = arith.constant 1.000000e+00 : f32
    %9 = vector.broadcast %cst_7 : f32 to vector<8x128xf32>
    %10 = arith.maximumf %9, %8 : vector<8x128xf32>
    %11 = vector.broadcast %cst_8 : f32 to vector<8x128xf32>
    %12 = arith.minimumf %11, %10 : vector<8x128xf32>
    %c128_i32 = arith.constant 128 : i32
    %13 = arith.muli %arg1, %c128_i32 : i32
    %14 = tpu.iota {dimensions = array<i32: 1>} : vector<8x128xi32>
    %15 = vector.broadcast %13 : i32 to vector<8x128xi32>
    %16 = arith.addi %15, %14 : vector<8x128xi32>
    %c0_9 = arith.constant 0 : index
    %c0_10 = arith.constant 0 : index
    %17 = vector.load %arg6[%c0_9, %c0_10] : memref<8x1xi32, #tpu.memory_space<vmem>>, vector<8x1xi32>
    %18 = vector.broadcast %17 : vector<8x1xi32> to vector<8x128xi32>
    %19 = arith.cmpi eq, %16, %18 : vector<8x128xi32>
    %cst_11 = arith.constant 0.000000e+00 : f32
    %20 = vector.broadcast %cst_11 : f32 to vector<8x128xf32>
    %21 = arith.select %19, %12, %20 : vector<8x128xi1>, vector<8x128xf32>
    %cst_12 = arith.constant dense<0.000000e+00> : vector<8xf32>
    %22 = vector.multi_reduction <add>, %21, %cst_12 [1] : vector<8x128xf32> to vector<8xf32>
    %23 = vector.shape_cast %22 : vector<8xf32> to vector<8x1xf32>
    %24 = arith.mulf %23, %23 : vector<8x1xf32>
    %cst_13 = arith.constant 1.000000e+00 : f32
    %25 = vector.broadcast %cst_13 : f32 to vector<8x1xf32>
    %26 = arith.subf %25, %24 : vector<8x1xf32>
    %cst_14 = arith.constant 0.000000e+00 : f32
    %27 = vector.broadcast %cst_14 : f32 to vector<8x1xf32>
    %28 = arith.maximumf %26, %27 : vector<8x1xf32>
    %29 = math.sqrt %28 : vector<8x1xf32>
    %cst_15 = arith.constant 0.980066597 : f32
    %30 = vector.broadcast %cst_15 : f32 to vector<8x1xf32>
    %31 = arith.mulf %23, %30 : vector<8x1xf32>
    %cst_16 = arith.constant 0.198669329 : f32
    %32 = vector.broadcast %cst_16 : f32 to vector<8x1xf32>
    %33 = arith.mulf %29, %32 : vector<8x1xf32>
    %34 = arith.subf %31, %33 : vector<8x1xf32>
    %cst_17 = arith.constant -0.980066597 : f32
    %35 = vector.broadcast %cst_17 : f32 to vector<8x1xf32>
    %36 = arith.cmpf ogt, %23, %35 : vector<8x1xf32>
    %cst_18 = arith.constant 0.0397338644 : f32
    %37 = vector.broadcast %cst_18 : f32 to vector<8x1xf32>
    %38 = arith.subf %23, %37 : vector<8x1xf32>
    %39 = arith.select %36, %34, %38 : vector<8x1xi1>, vector<8x1xf32>
    %40 = vector.shape_cast %39 : vector<8x1xf32> to vector<8x1xf32>
    %41 = vector.broadcast %40 : vector<8x1xf32> to vector<8x128xf32>
    %42 = arith.select %19, %41, %12 : vector<8x128xi1>, vector<8x128xf32>
    %cst_19 = arith.constant 3.000000e+01 : f32
    %43 = vector.broadcast %cst_19 : f32 to vector<8x128xf32>
    %44 = arith.mulf %42, %43 : vector<8x128xf32>
    %c0_20 = arith.constant 0 : index
    %c0_21 = arith.constant 0 : index
    %45 = vector.load %arg7[%c0_20, %c0_21] : memref<8x128xf32, #tpu.memory_space<vmem>>, vector<8x128xf32>
    tpu.vector_store %arg7[%c0_20, %c0_21], %44 {strides = array<i32>} : memref<8x128xf32, #tpu.memory_space<vmem>>, vector<8x128xf32>,
    return
  }
  func.func @transform_0(%arg0: i32, %arg1: i32) -> (i32, i32) {
    %c0_i32 = arith.constant 0 : i32
    %c0_i32_0 = arith.constant 0 : i32
    return %arg0, %c0_i32 : i32, i32
  }
  func.func @transform_1(%arg0: i32, %arg1: i32) -> (i32, i32) {
    %c0_i32 = arith.constant 0 : i32
    %c0_i32_0 = arith.constant 0 : i32
    return %arg1, %c0_i32 : i32, i32
  }
  func.func @transform_2(%arg0: i32, %arg1: i32) -> (i32, i32) {
    %c0_i32 = arith.constant 0 : i32
    %c0_i32_0 = arith.constant 0 : i32
    return %arg0, %c0_i32 : i32, i32
  }
  func.func @transform_3(%arg0: i32, %arg1: i32) -> (i32, i32) {
    %c0_i32 = arith.constant 0 : i32
    %c0_i32_0 = arith.constant 0 : i32
    return %c0_i32, %arg1 : i32, i32
  }
  func.func @transform_4(%arg0: i32, %arg1: i32) -> (i32, i32) {
    %c0_i32 = arith.constant 0 : i32
    %c0_i32_0 = arith.constant 0 : i32
    return %arg0, %c0_i32 : i32, i32
  }
  func.func @transform_5(%arg0: i32, %arg1: i32) -> (i32, i32) {
    %c0_i32 = arith.constant 0 : i32
    return %arg0, %arg1 : i32, i32
  }
}

</mosaic_0001>

<bundles_post_ra>
// kernel: tpu_custom_call.1
= control target key start
LH: loop header
LB: loop body
LE: loop exit
PB: predicated region body
PF: predicated region fallthrough
CT: control target
= control target key end

     0   :  { %10 = vsyncpa [#allocation3], 0  ;;  %s400_s0 = inlined_call_operand.vmem [shape: f32[8,128], index: 0, kind: input, shape index: {}]   ;;  %s401_s1 = inlined_call_operand.hbm [shape: f32[128,128], index: 1, kind: input, shape index: {}]   ;;  %s402_s2 = inlined_call_operand.vmem [shape: f32[8,1], index: 2, kind: input, shape index: {}]   ;;  %s403_s3 = inlined_call_operand.vmem [shape: f32[1,128], index: 3, kind: input, shape index: {}]   ;;  %s404_s4 = inlined_call_operand.vmem [shape: s32[8,1], index: 4, kind: input, shape index: {}]   ;;  %s405_s5 = inlined_call_operand.hbm [shape: f32[8,128], index: 5, kind: output, shape index: {}]  }
   0x1   :  { %11 = vsyncpa [#allocation4], 0  ;;  %s324_s18 = smov [#allocation2]   ;;  %s276_s22 = scalar_lea.hbm %s401_s1, 2048 }
   0x2   :  { %s19_s19 = sshll.u32 %s324_s18, 4  ;;  %p277_p0 = scmp.ne.s32.totalorder %s401_s1, %s276_s22  ;;  %s20_s19 = int_to_ptr.vmem [resolvable:$true] %s19_s19 }
   0x3   :  { %p280_p1 = scmp.lt.u32.totalorder %s276_s22, %s401_s1 }
   0x5   :  { %p282_p2 = pnand %p280_p1, %p277_p0 }
   0x7   :  { %285 = shalt.err (!%p282_p2)
}
   0x8   :  { %s286_s27 = scalar_lea.vmem %s20_s19, 2048  ;;  %p291_p4 = scmp.lt.s32.totalorder %s20_s19, %s20_s19 }
   0x9   :  { %p287_p3 = scmp.ne.s32.totalorder %s20_s19, %s286_s27  ;;  %p292_p5 = scmp.lt.s32.totalorder %s286_s27, %s286_s27 }
   0xb   :  { %p293_p6 = por %p292_p5, %p291_p4 }
   0xd   :  { %p294_p7 = pnand %p293_p6, %p287_p3 }
   0xf   :  { %297 = shalt.err (!%p294_p7)
}
  0x10   :  { %s325_s28 = smov 128   ;;  %s326_s29 = smov 8  }
  0x11   :  { %25 = dma.hbm_to_vmem [thread:$0]  %s401_s1, 2048, %s20_s19, [#allocation3], %s325_s28, %s325_s28, %s326_s29  }
  0x12   :  { %320 = dma.done.wait [#allocation3], 2048  }
  0x13   :  { %321 = vsyncadd [#allocation3], 4294965248  ;;  %v327_v0 = vmov 0.0|0.0   ;;  %vm328_vm0 = vmmov 0   ;;  %v329_v1 = vmov 0.0   ;;  %v330_v2 = vmov 0  }
  0x14   :  { %241 = vmatprep.subr.bf16.mxu0 %v327_v0  ;;  %238 = vmatprep.mubr.msk.f32.mxu0 %vm328_vm0, %v329_v1  ;;  %v36_v3 = vld [vmem:[#allocation2] sm:$0xff]  ;;  %v37_v4 = vld [vmem:[#allocation2 + $0x8] sm:$0xff]  ;;  %v38_v6 = vld [vmem:[#allocation2 + $0x10] sm:$0xff]  ;;  %v140_v31 = vlaneseq }
  0x15   :  { %273 = vset.pattern.permute.xlu0 %v330_v2  ;;  %v242_v5 = vpack.c.bf16 %v37_v4, %v36_v3  ;;  %v39_v7 = vld [vmem:[#allocation2 + $0x18] sm:$0xff]  ;;  %v122_v8 = vld [vmem:[%s402_s2] sm:$0xff]  ;;  %v41_v12 = vld [vmem:[#allocation2 + $0x28] sm:$0xff] }
  0x16   :  { %125 = vperm.xlu0 %273, %v122_v8   ;;  %v245_v9 = vpack.c.bf16 %v39_v7, %v38_v6  ;;  %v144_v10 = vld [vmem:[%s404_s4] sm:$0xff]  ;;  %v42_v14 = vld [vmem:[#allocation2 + $0x30] sm:$0xff]  ;;  %v43_v15 = vld [vmem:[#allocation2 + $0x38] sm:$0xff]  ;;  %v141_v36 = vand.u32 127, %v140_v31 }
  0x17   :  { %243 = vmatpush3.bf16.xpose.msra.mxu0 %v242_v5  ;;  %v40_v11 = vld [vmem:[#allocation2 + $0x20] sm:$0xff]  ;;  %v251_v16 = vpack.c.bf16 %v43_v15, %v42_v14  ;;  %v45_v18 = vld [vmem:[#allocation2 + $0x48] sm:$0xff]  ;;  %v46_v20 = vld [vmem:[#allocation2 + $0x50] sm:$0xff] }
  0x18   :  { %244 = vmatprep.subr.bf16.mxu0 %v327_v0  ;;  %v248_v13 = vpack.c.bf16 %v41_v12, %v40_v11  ;;  %v44_v17 = vld [vmem:[#allocation2 + $0x40] sm:$0xff]  ;;  %v47_v21 = vld [vmem:[#allocation2 + $0x58] sm:$0xff]  ;;  %v49_v24 = vld [vmem:[#allocation2 + $0x68] sm:$0xff] }
  0x19   :  { %v254_v19 = vpack.c.bf16 %v45_v18, %v44_v17  ;;  %v257_v22 = vpack.c.bf16 %v47_v21, %v46_v20  ;;  %v48_v23 = vld [vmem:[#allocation2 + $0x60] sm:$0xff]  ;;  %v50_v26 = vld [vmem:[#allocation2 + $0x70] sm:$0xff]  ;;  %v51_v27 = vld [vmem:[#allocation2 + $0x78] sm:$0xff] }
  0x1a   :  { %146 = vperm.xlu0 %273, %v144_v10   ;;  %v260_v25 = vpack.c.bf16 %v49_v24, %v48_v23  ;;  %v263_v28 = vpack.c.bf16 %v51_v27, %v50_v26  ;;  %v35_v29 = vld [vmem:[%s400_s0] sm:$0xff]  ;;  %s331_s0 = smov [#allocation5]  }
  0x1b   :  { %v186_v33 = vld [vmem:[%s403_s3] ss:$0 sm:$0xff]  ;;  %s177_s3 = sshll.u32 %s331_s0, 4  ;;  %s178_s3 = int_to_ptr.vmem [resolvable:$true] %s177_s3 }
  0x1c   :  { %s298_s12 = scalar_lea.vmem %s178_s3, 128  ;;  %p303_p9 = scmp.lt.s32.totalorder %s178_s3, %s178_s3 }
  0x1d   :  { %p299_p8 = scmp.ne.s32.totalorder %s178_s3, %s298_s12  ;;  %p304_p10 = scmp.lt.s32.totalorder %s298_s12, %s298_s12 }
  0x1f   :  { %246 = vmatpush3.bf16.xpose.msra.mxu0 %v245_v9  ;;  %p305_p11 = por %p304_p10, %p303_p9 }
  0x20   :  { %247 = vmatprep.subr.bf16.mxu0 %v327_v0 }
  0x21   :  { %p306_p12 = pnand %p305_p11, %p299_p8 }
  0x27   :  { %249 = vmatpush3.bf16.xpose.msra.mxu0 %v248_v13 }
  0x28   :  { %250 = vmatprep.subr.bf16.mxu0 %v327_v0 }
  0x2f   :  { %252 = vmatpush3.bf16.xpose.msra.mxu0 %v251_v16 }
  0x30   :  { %253 = vmatprep.subr.bf16.mxu0 %v327_v0 }
  0x37   :  { %255 = vmatpush3.bf16.xpose.msra.mxu0 %v254_v19 }
  0x38   :  { %256 = vmatprep.subr.bf16.mxu0 %v327_v0 }
  0x3f   :  { %258 = vmatpush3.bf16.xpose.msra.mxu0 %v257_v22 }
  0x40   :  { %259 = vmatprep.subr.bf16.mxu0 %v327_v0 }
  0x47   :  { %261 = vmatpush3.bf16.xpose.msra.mxu0 %v260_v25 }
  0x48   :  { %262 = vmatprep.subr.bf16.mxu0 %v327_v0 }
  0x4f   :  { %264 = vmatpush3.bf16.xpose.msra.mxu0 %v263_v28 }
  0x56   :  { %239 = vmatmul.mubr.f32.vlgmr.msra.gmra.mrb[0].mxu0 %v35_v29 }
  0x95   :  { %v126_v30 = vpop.permute.xlu0 %125 }
  0x99   :  { %v147_v37 = vpop.permute.xlu0 %146 }
  0x9a   :  { %vm148_vm1 = vcmp.eq.s32.totalorder %v141_v36, %v147_v37 }
 0x129   :  { %v118_v32 = vpop.f32.mrb[0].mxu0 }
 0x12a   :  { %v128_v34 = vmul.f32 %v126_v30, %v118_v32  ;;  %v240_v35 = vpop.f32.mrb[1].mxu0 }
 0x12c   :  { %v136_v38 = vmul.f32 %v186_v33, %v128_v34 }
 0x12e   :  { %v187_v39 = vclamps-f32 %v136_v38, 1.0 }
 0x130   :  { %v149_v40 = vsel %vm148_vm1, %v187_v39, 0.0 }
 0x131   :  { %150 = vadd.xlane.f32.xlu1 %v149_v40 }
 0x1be   :  { %v151_v41 = vpop.xlane.xlu1 %150 }
 0x1bf   :  { %v152_v42 = vmul.f32 %v151_v41, %v151_v41  ;;  %v162_v50 = vmul.f32 0.9800666, %v151_v41  ;;  %v188_v53 = vadd.f32 -0.039733864, %v151_v41  ;;  %vm165_vm4 = vcmp.gt.f32.partialorder %v151_v41, -0.9800666 }
 0x1c1   :  { %v153_v43 = vsub.f32 1.0, %v152_v42 }
 0x1c3   :  { %v154_v44 = vmax.f32 %v153_v43, 0.0 }
 0x1c5   :  { %274 = vrsqrt.f32 %v154_v44  ;;  %vm157_vm2 = vcmp.eq.f32.partialorder %v154_v44, inf  ;;  %v160_v47 = vand.u32 2147483648, %v154_v44  ;;  %vm159_vm3 = vcmp.eq.f32.partialorder %v154_v44, 0.0 }
 0x1cf   :  { %v275_v45 = vpop.eup %274 }
 0x1d0   :  { %v156_v46 = vmul.f32 %v275_v45, %v154_v44 }
 0x1d2   :  { %v158_v48 = vsel %vm157_vm2, %v154_v44, %v156_v46 }
 0x1d3   :  { %v161_v49 = vsel %vm159_vm3, %v160_v47, %v158_v48 }
 0x1d4   :  { %v163_v51 = vmul.f32 0.19866933, %v161_v49 }
 0x1d6   :  { %v164_v52 = vsub.f32 %v162_v50, %v163_v51 }
 0x1d8   :  { %v167_v54 = vsel %vm165_vm4, %v164_v52, %v188_v53 }
 0x1d9   :  { %v168_v55 = vsel %vm148_vm1, %v167_v54, %v187_v39 }
 0x1da   :  { %v169_v56 = vmul.f32 30.0, %v168_v55 }
 0x1dc   :  { %170 = vst [vmem:[#allocation5] sm:$0xff] %v169_v56 }
 0x1dd   :  { %309 = shalt.err (!%p306_p12)
}
 0x1de   :  { %s310_s15 = scalar_lea.hbm %s405_s5, 128 }
 0x1df   :  { %p311_p13 = scmp.ne.s32.totalorder %s405_s5, %s310_s15  ;;  %p314_p0 = scmp.lt.u32.totalorder %s310_s15, %s405_s5 }
 0x1e1   :  { %p316_p1 = pnand %p314_p0, %p311_p13 }
 0x1e3   :  { %319 = shalt.err (!%p316_p1)
}
 0x1e4   :  { %180 = dma.vmem_to_hbm [thread:$0]  %s178_s3, 128, %s405_s5, [#allocation4]  }
 0x1e5   :  { %322 = dma.done.wait [#allocation4], 128  }
 0x1e6   :  { %323 = vsyncadd [#allocation4], 4294967168 }
 0x1e7   :  { %184 = vsyncpa [#allocation3], 1 }
 0x1e8   :  { %185 = vsyncpa [#allocation4], 1 }

</bundles_post_ra>
